<compile_context>
chip_gen: v5e
topology: v5e:2x2
jax: 0.10.0
libtpu: 0.0.40
codegen_flags: <defaults>
</compile_context>

<pallas_src>
import functools

import jax
import jax.numpy as jnp
from jax.experimental import pallas as pl
from jax.experimental.pallas import tpu as pltpu


def _split_sum_concat_kernel(x_ref, o_ref, *, s1, s2):
    # x_ref: (TM, s1 + s2 + s1) VMEM tile; o_ref: (TM, s1 + s2).
    first = x_ref[:, :s1]
    third = x_ref[:, s1 + s2:2 * s1 + s2]
    summed = first + third
    if s2 == 0:
        o_ref[...] = summed
    else:
        second = x_ref[:, s1:s1 + s2]
        # One full-width (lane-dense) store of the concatenated result.
        o_ref[...] = jnp.concatenate([summed, second], axis=-1)


_SUBLANE_PACK = {4: 8, 2: 16, 1: 32}  # f32 / bf16 / int8-fp8 sublane packing


def _choose_row_tile(rows, in_cols, out_cols, itemsize):
    """Largest dtype-aligned row tile that keeps double-buffered tiles small."""
    sublane = _SUBLANE_PACK.get(itemsize, 8)
    budget = 8 * 1024 * 1024  # bytes for pipelined tiles; v7x-safe headroom
    per_row = 2 * (in_cols + out_cols) * itemsize  # x2: double buffering
    tm = budget // max(per_row, 1)
    tm = max(sublane, min(1024, (tm // sublane) * sublane))
    if rows <= tm:
        return rows  # full-extent row block (always a legal block shape)
    return tm


def split_sum_concat(x, split_size1, split_size2):
    """JAX/Pallas equivalent of SplitSumConcat(s1, s2).forward(x) for 2D/3D x."""
    if x.ndim not in (2, 3):
        raise ValueError("SplitSumConcat supports 2D or 3D inputs")
    last = x.shape[-1]
    s1, s2 = int(split_size1), int(split_size2)
    s3 = last - s1 - s2
    if s1 <= 0 or s2 < 0 or s3 <= 0:
        raise ValueError("invalid split sizes for the given last dimension")
    if s3 != s1:
        # TODO(synk): PyTorch would broadcast when s3 == 1 or s1 == 1; only the
        # clean elementwise case (s3 == s1) is implemented here.
        raise ValueError("third split must match first split size (s3 == s1)")
    out_last = s1 + s2

    lead_shape = x.shape[:-1]
    rows = 1
    for d in lead_shape:
        rows *= d
    x2d = x.reshape(rows, last)

    tm = _choose_row_tile(rows, last, out_last, jnp.dtype(x.dtype).itemsize)
    grid = (pl.cdiv(rows, tm),)

    kernel = functools.partial(_split_sum_concat_kernel, s1=s1, s2=s2)

    out2d = pl.pallas_call(
        kernel,
        out_shape=jax.ShapeDtypeStruct((rows, out_last), x.dtype),
        grid=grid,
        in_specs=[pl.BlockSpec((tm, last), lambda i: (i, 0))],
        out_specs=pl.BlockSpec((tm, out_last), lambda i: (i, 0)),
        compiler_params=pltpu.CompilerParams(
            dimension_semantics=("parallel",),
        ),
    )(x2d)

    return out2d.reshape(*lead_shape, out_last)


if __name__ == "__main__":
    key = jax.random.PRNGKey(0)
    k2d, k3d = jax.random.split(key)

    # 3D case: (batch=2, seq=8, hidden=512) with splits (128, 256, 128).
    s1, s2 = 128, 256
    x3 = jax.random.normal(k3d, (2, 8, s1 + s2 + s1), dtype=jnp.float32)
    y3 = jax.block_until_ready(split_sum_concat(x3, s1, s2))
    ref3 = jnp.concatenate(
        [x3[:, :, :s1] + x3[:, :, s1 + s2:], x3[:, :, s1:s1 + s2]], axis=-1)
    assert y3.shape == (2, 8, s1 + s2)
    assert jnp.allclose(y3, ref3, atol=1e-6), "3D mismatch"

    # 2D case: (batch=16, features=384) with splits (128, 128, 128).
    t1, t2 = 128, 128
    x2 = jax.random.normal(k2d, (16, t1 + t2 + t1), dtype=jnp.float32)
    y2 = jax.block_until_ready(split_sum_concat(x2, t1, t2))
    ref2 = jnp.concatenate(
        [x2[:, :t1] + x2[:, t1 + t2:], x2[:, t1:t1 + t2]], axis=-1)
    assert y2.shape == (16, t1 + t2)
    assert jnp.allclose(y2, ref2, atol=1e-6), "2D mismatch"

    print("KERNEL_OK")
</pallas_src>

<mosaic_0001>
module attributes {stable_mosaic.version = 11 : i64} {
  func.func @_split_sum_concat_kernel(%arg0: i32, %arg1: memref<16x512xf32, #tpu.memory_space<vmem>>, %arg2: memref<16x384xf32, #tpu.memory_space<vmem>>) attributes {dimension_semantics = [#tpu.dimension_semantics<parallel>], iteration_bounds = array<i64: 1>, scalar_prefetch = 0 : i64, scratch_operands = 0 : i64, tpu.core_type = #tpu.core_type<tc>, window_params = [{transform_indices = @transform_0, window_bounds = array<i64: 16, 512>}, {transform_indices = @transform_1, window_bounds = array<i64: 16, 384>}]} {
    %c0 = arith.constant 0 : index
    %c0_0 = arith.constant 0 : index
    %0 = vector.load %arg1[%c0, %c0_0] : memref<16x512xf32, #tpu.memory_space<vmem>>, vector<16x128xf32>
    %c0_1 = arith.constant 0 : index
    %c384 = arith.constant 384 : index
    %1 = vector.load %arg1[%c0_1, %c384] : memref<16x512xf32, #tpu.memory_space<vmem>>, vector<16x128xf32>
    %2 = arith.addf %0, %1 : vector<16x128xf32>
    %c0_2 = arith.constant 0 : index
    %c128 = arith.constant 128 : index
    %3 = vector.load %arg1[%c0_2, %c128] : memref<16x512xf32, #tpu.memory_space<vmem>>, vector<16x256xf32>
    %4 = tpu.concatenate %2, %3 in 1 : vector<16x128xf32>, vector<16x256xf32> -> vector<16x384xf32>
    %c0_3 = arith.constant 0 : index
    %c0_4 = arith.constant 0 : index
    %5 = vector.load %arg2[%c0_3, %c0_4] : memref<16x384xf32, #tpu.memory_space<vmem>>, vector<16x384xf32>
    tpu.vector_store %arg2[%c0_3, %c0_4], %4 {strides = array<i32>} : memref<16x384xf32, #tpu.memory_space<vmem>>, vector<16x384xf32>,
    return
  }
  func.func @transform_0(%arg0: i32) -> (i32, i32) {
    %c0_i32 = arith.constant 0 : i32
    %c0_i32_0 = arith.constant 0 : i32
    return %arg0, %c0_i32 : i32, i32
  }
  func.func @transform_1(%arg0: i32) -> (i32, i32) {
    %c0_i32 = arith.constant 0 : i32
    %c0_i32_0 = arith.constant 0 : i32
    return %arg0, %c0_i32 : i32, i32
  }
}

</mosaic_0001>

<bundles_post_ra>
// kernel: tpu_custom_call.1
= control target key start
LH: loop header
LB: loop body
LE: loop exit
PB: predicated region body
PF: predicated region fallthrough
CT: control target
= control target key end

     0   :  { %6 = vsyncpa [#allocation3], 0  ;;  %s140_s0 = inlined_call_operand.hbm [shape: f32[16,512], index: 0, kind: input, shape index: {}]   ;;  %s141_s1 = inlined_call_operand.hbm [shape: f32[16,384], index: 1, kind: output, shape index: {}]  }
   0x1   :  { %7 = vsyncpa [#allocation4], 0  ;;  %s12_s8 = sshll.u32 %s140_s0, 4  ;;  %s118_s9 = smov [#allocation2]   ;;  %s13_s8 = int_to_ptr.hbm [resolvable:$true] %s12_s8 }
   0x2   :  { %s14_s10 = sshll.u32 %s118_s9, 4  ;;  %s119_s11 = smov 512   ;;  %s15_s10 = int_to_ptr.vmem [resolvable:$true] %s14_s10 }
   0x3   :  { %s120_s12 = smov 32  }
   0x4   :  { %20 = dma.hbm_to_vmem [thread:$0]  %s13_s8, 1024, %s15_s10, [#allocation3], %s119_s11, %s119_s11, %s120_s12  }
   0x5   :  { %114 = dma.done.wait [#allocation3], 1024  }
   0x6   :  { %115 = vsyncadd [#allocation3], 4294966272  ;;  %v25_v0 = vld [vmem:[#allocation2] sm:$0xff]  ;;  %v27_v1 = vld [vmem:[#allocation2 + $0x18] sm:$0xff]  ;;  %s121_s13 = smov [#allocation5]   ;;  %s47_s17 = sshll.u32 %s141_s1, 4  ;;  %s48_s17 = int_to_ptr.hbm [resolvable:$true] %s47_s17 }
   0x7   :  { %v31_v2 = vld [vmem:[#allocation2 + $0x8] sm:$0xff]  ;;  %s45_s14 = sshll.u32 %s121_s13, 4  ;;  %v29_v3 = vadd.f32 %v27_v1, %v25_v0  ;;  %v32_v4 = vld [vmem:[#allocation2 + $0x10] sm:$0xff]  ;;  %v26_v5 = vld [vmem:[#allocation2 + $0x20] sm:$0xff]  ;;  %s122_s0 = smov 384   ;;  %s46_s14 = int_to_ptr.vmem [resolvable:$true] %s45_s14 }
   0x8   :  { %36 = vst [vmem:[#allocation5 + $0x8] sm:$0xff] %v31_v2  ;;  %v28_v6 = vld [vmem:[#allocation2 + $0x38] sm:$0xff]  ;;  %v33_v8 = vld [vmem:[#allocation2 + $0x28] sm:$0xff]  ;;  %v34_v9 = vld [vmem:[#allocation2 + $0x30] sm:$0xff]  ;;  %s123_s18 = smov 24  }
   0x9   :  { %37 = vst [vmem:[#allocation5 + $0x10] sm:$0xff] %v32_v4  ;;  %v30_v7 = vadd.f32 %v28_v6, %v26_v5 }
   0xa   :  { %35 = vst [vmem:[#allocation5] sm:$0xff] %v29_v3 }
   0xb   :  { %38 = vst [vmem:[#allocation5 + $0x18] sm:$0xff] %v30_v7 }
   0xc   :  { %39 = vst [vmem:[#allocation5 + $0x20] sm:$0xff] %v33_v8 }
   0xd   :  { %40 = vst [vmem:[#allocation5 + $0x28] sm:$0xff] %v34_v9 }
   0xe   :  { %53 = dma.vmem_to_hbm [thread:$0]  %s46_s14, 768, %s48_s17, [#allocation4], %s122_s0, %s122_s0, %s123_s18  }
   0xf   :  { %116 = dma.done.wait [#allocation4], 768  }
  0x10   :  { %117 = vsyncadd [#allocation4], 4294966528 }
  0x11   :  { %58 = vsyncpa [#allocation3], 1 }
  0x12   :  { %59 = vsyncpa [#allocation4], 1 }

</bundles_post_ra>
